<compile_context>
chip_gen: v7x
topology: tpu7x:2x2x1
jax: 0.10.0
libtpu: 0.0.40
codegen_flags: <defaults>
</compile_context>

<pallas_src>
import jax
import jax.numpy as jnp
from jax import lax
from jax.experimental import pallas as pl
from jax.experimental.pallas import tpu as pltpu


def _make_conv_kernel(N, C_in, C_out, KH, KW, img_w, HW):
    """Builds the kernel body; all shape parameters are Python ints (static)."""

    def kernel(x_ref, w_ref, b_ref, o_ref):
        # x_ref: (N, C_in, HW + pad)   bf16  -- spatial flattened onto lanes
        # w_ref: (KH*KW, C_out, C_in)  bf16  -- x*2 already folded in
        # b_ref: (C_out, 1)            f32
        # o_ref: (N, C_out, HW)        f32   -- HW is a multiple of 128 here
        x = x_ref[...]                                     # whole input (~6 KB)
        w = w_ref[...]
        bias = jnp.broadcast_to(b_ref[...], (C_out, HW))   # hoisted, done once
        for n in range(N):                                 # static unroll (N=2)
            acc = bias                                     # f32 accumulator
            for kh in range(KH):
                for kw in range(KW):
                    kk = kh * KW + kw
                    s = kh * img_w + kw                    # static lane shift
                    xs = x[n, :, s:s + HW]                 # (C_in, HW) bf16 tap
                    acc = acc + jnp.dot(w[kk], xs,         # MXU, f32 accumulate
                                        preferred_element_type=jnp.float32)
            o_ref[n] = acc                                 # lane-dense f32 store

    return kernel


@jax.jit
def conv_model_forward(x, weight, bias):
    """Conv2d(c_in, c_out, 3, stride=1, padding=0)(x * 2).

    x:      (N, C_in, H, W)      f32, NCHW (PyTorch convention)
    weight: (C_out, C_in, 3, 3)  f32, OIHW (PyTorch convention)
    bias:   (C_out,)             f32
    returns (N, C_out, H-2, W-2) f32, NCHW
    """
    N, C_in, H, W = x.shape
    C_out, _, KH, KW = weight.shape
    Ho, Wo = H - KH + 1, W - KW + 1
    HW = H * W
    # lane head-room for the largest tap shift; keep HW+pad 128-aligned
    max_shift = (KH - 1) * W + (KW - 1)
    HWp = ((HW + max_shift + 127) // 128) * 128

    # ---- glue (all fused under jit; a few KB of data movement) --------------
    x_flat = x.reshape(N, C_in, HW).astype(jnp.bfloat16)          # free reshape
    x_pad = jnp.pad(x_flat, ((0, 0), (0, 0), (0, HWp - HW)))
    # w2[kh*KW+kw, co, ci] = 2 * weight[co, ci, kh, kw]   (288 elements)
    w2 = (weight * 2.0).transpose(2, 3, 0, 1).reshape(KH * KW, C_out, C_in)
    w2 = w2.astype(jnp.bfloat16)
    b2 = bias.reshape(C_out, 1).astype(jnp.float32)

    # ---- hot path: one kernel invocation, everything resident in VMEM -------
    vmem = pl.BlockSpec(memory_space=pltpu.MemorySpace.VMEM)
    out_full = pl.pallas_call(
        _make_conv_kernel(N, C_in, C_out, KH, KW, W, HW),
        out_shape=jax.ShapeDtypeStruct((N, C_out, HW), jnp.float32),
        in_specs=[vmem, vmem, vmem],
        out_specs=vmem,
    )(x_pad, w2, b2)

    # full-grid result is already NCHW-ordered; keep the valid window
    return out_full.reshape(N, C_out, H, W)[:, :, :Ho, :Wo]


if __name__ == "__main__":
    key = jax.random.PRNGKey(0)
    k_x, k_w, k_b = jax.random.split(key, 3)

    N, C_in, C_out, H, W = 2, 4, 8, 16, 16

    x = jax.random.normal(k_x, (N, C_in, H, W), dtype=jnp.float32)
    # deterministic synthetic conv params (Conv2d(c_in=4, c_out=8, kernel_size=3))
    weight = jax.random.normal(k_w, (C_out, C_in, 3, 3), dtype=jnp.float32) * 0.1
    bias = jax.random.normal(k_b, (C_out,), dtype=jnp.float32) * 0.1

    out = jax.block_until_ready(conv_model_forward(x, weight, bias))
    assert out.shape == (N, C_out, H - 2, W - 2)

    # (1) structural check: identical math with the same bf16-rounded operands
    #     and exact f32 accumulation -- validates the in-kernel tap construction
    #     and ordering (tight tolerance; only f32 summation order differs).
    xb = x.astype(jnp.bfloat16).astype(jnp.float32)
    wb = (weight * 2.0).astype(jnp.bfloat16).astype(jnp.float32)
    ref_same_prec = lax.conv_general_dilated(
        xb, wb, window_strides=(1, 1), padding="VALID",
        dimension_numbers=("NCHW", "OIHW", "NCHW"),
        precision=lax.Precision.HIGHEST,
    ) + bias[None, :, None, None]
    assert jnp.allclose(out, ref_same_prec, atol=1e-4, rtol=1e-4)

    # (2) semantic check vs. the f32 module reference (Conv2d(x*2) + bias);
    #     tolerance accounts for the bf16 matmul operands.
    ref_f32 = lax.conv_general_dilated(
        x * 2.0, weight, window_strides=(1, 1), padding="VALID",
        dimension_numbers=("NCHW", "OIHW", "NCHW"),
        precision=lax.Precision.HIGHEST,
    ) + bias[None, :, None, None]
    assert jnp.allclose(out, ref_f32, atol=2e-2, rtol=2e-2)

    print("KERNEL_OK")
</pallas_src>

<mosaic_0001>
module attributes {stable_mosaic.version = 11 : i64} {
  func.func @kernel(%arg0: memref<2x4x384xbf16, #tpu.memory_space<vmem>>, %arg1: memref<9x8x4xbf16, #tpu.memory_space<vmem>>, %arg2: memref<8x1xf32, #tpu.memory_space<vmem>>, %arg3: memref<2x8x256xf32, #tpu.memory_space<vmem>>) attributes {dimension_semantics = [], scalar_prefetch = 0 : i64, scratch_operands = 0 : i64, tpu.core_type = #tpu.core_type<tc>} {
    %c0 = arith.constant 0 : index
    %c0_0 = arith.constant 0 : index
    %c0_1 = arith.constant 0 : index
    %0 = vector.load %arg0[%c0, %c0_0, %c0_1] : memref<2x4x384xbf16, #tpu.memory_space<vmem>>, vector<2x4x384xbf16>
    %c0_2 = arith.constant 0 : index
    %c0_3 = arith.constant 0 : index
    %c0_4 = arith.constant 0 : index
    %1 = vector.load %arg1[%c0_2, %c0_3, %c0_4] : memref<9x8x4xbf16, #tpu.memory_space<vmem>>, vector<9x8x4xbf16>
    %c0_5 = arith.constant 0 : index
    %c0_6 = arith.constant 0 : index
    %2 = vector.load %arg2[%c0_5, %c0_6] : memref<8x1xf32, #tpu.memory_space<vmem>>, vector<8x1xf32>
    %3 = vector.shape_cast %2 : vector<8x1xf32> to vector<8x1xf32>
    %4 = vector.broadcast %3 : vector<8x1xf32> to vector<8x256xf32>
    %5 = vector.extract_strided_slice %0 {offsets = [0, 0, 0], sizes = [1, 4, 256], strides = [1, 1, 1]} : vector<2x4x384xbf16> to vector<1x4x256xbf16>
    %6 = vector.shape_cast %5 : vector<1x4x256xbf16> to vector<4x256xbf16>
    %7 = vector.extract_strided_slice %1 {offsets = [0, 0, 0], sizes = [1, 8, 4], strides = [1, 1, 1]} : vector<9x8x4xbf16> to vector<1x8x4xbf16>
    %8 = vector.shape_cast %7 : vector<1x8x4xbf16> to vector<8x4xbf16>
    %cst = arith.constant dense<0.000000e+00> : vector<8x256xf32>
    %9 = tpu.matmul %8, %6, %cst {dimension_numbers = #tpu.dot_dimension_numbers<[1], [0], [0], [1], [0, 0, 1, 1], [], []>} : vector<8x4xbf16>, vector<4x256xbf16>, vector<8x256xf32> -> vector<8x256xf32>
    %10 = arith.addf %4, %9 : vector<8x256xf32>
    %11 = vector.extract_strided_slice %0 {offsets = [0, 0, 1], sizes = [1, 4, 256], strides = [1, 1, 1]} : vector<2x4x384xbf16> to vector<1x4x256xbf16>
    %12 = vector.shape_cast %11 : vector<1x4x256xbf16> to vector<4x256xbf16>
    %13 = vector.extract_strided_slice %1 {offsets = [1, 0, 0], sizes = [1, 8, 4], strides = [1, 1, 1]} : vector<9x8x4xbf16> to vector<1x8x4xbf16>
    %14 = vector.shape_cast %13 : vector<1x8x4xbf16> to vector<8x4xbf16>
    %cst_7 = arith.constant dense<0.000000e+00> : vector<8x256xf32>
    %15 = tpu.matmul %14, %12, %cst_7 {dimension_numbers = #tpu.dot_dimension_numbers<[1], [0], [0], [1], [0, 0, 1, 1], [], []>} : vector<8x4xbf16>, vector<4x256xbf16>, vector<8x256xf32> -> vector<8x256xf32>
    %16 = arith.addf %10, %15 : vector<8x256xf32>
    %17 = vector.extract_strided_slice %0 {offsets = [0, 0, 2], sizes = [1, 4, 256], strides = [1, 1, 1]} : vector<2x4x384xbf16> to vector<1x4x256xbf16>
    %18 = vector.shape_cast %17 : vector<1x4x256xbf16> to vector<4x256xbf16>
    %19 = vector.extract_strided_slice %1 {offsets = [2, 0, 0], sizes = [1, 8, 4], strides = [1, 1, 1]} : vector<9x8x4xbf16> to vector<1x8x4xbf16>
    %20 = vector.shape_cast %19 : vector<1x8x4xbf16> to vector<8x4xbf16>
    %cst_8 = arith.constant dense<0.000000e+00> : vector<8x256xf32>
    %21 = tpu.matmul %20, %18, %cst_8 {dimension_numbers = #tpu.dot_dimension_numbers<[1], [0], [0], [1], [0, 0, 1, 1], [], []>} : vector<8x4xbf16>, vector<4x256xbf16>, vector<8x256xf32> -> vector<8x256xf32>
    %22 = arith.addf %16, %21 : vector<8x256xf32>
    %23 = vector.extract_strided_slice %0 {offsets = [0, 0, 16], sizes = [1, 4, 256], strides = [1, 1, 1]} : vector<2x4x384xbf16> to vector<1x4x256xbf16>
    %24 = vector.shape_cast %23 : vector<1x4x256xbf16> to vector<4x256xbf16>
    %25 = vector.extract_strided_slice %1 {offsets = [3, 0, 0], sizes = [1, 8, 4], strides = [1, 1, 1]} : vector<9x8x4xbf16> to vector<1x8x4xbf16>
    %26 = vector.shape_cast %25 : vector<1x8x4xbf16> to vector<8x4xbf16>
    %cst_9 = arith.constant dense<0.000000e+00> : vector<8x256xf32>
    %27 = tpu.matmul %26, %24, %cst_9 {dimension_numbers = #tpu.dot_dimension_numbers<[1], [0], [0], [1], [0, 0, 1, 1], [], []>} : vector<8x4xbf16>, vector<4x256xbf16>, vector<8x256xf32> -> vector<8x256xf32>
    %28 = arith.addf %22, %27 : vector<8x256xf32>
    %29 = vector.extract_strided_slice %0 {offsets = [0, 0, 17], sizes = [1, 4, 256], strides = [1, 1, 1]} : vector<2x4x384xbf16> to vector<1x4x256xbf16>
    %30 = vector.shape_cast %29 : vector<1x4x256xbf16> to vector<4x256xbf16>
    %31 = vector.extract_strided_slice %1 {offsets = [4, 0, 0], sizes = [1, 8, 4], strides = [1, 1, 1]} : vector<9x8x4xbf16> to vector<1x8x4xbf16>
    %32 = vector.shape_cast %31 : vector<1x8x4xbf16> to vector<8x4xbf16>
    %cst_10 = arith.constant dense<0.000000e+00> : vector<8x256xf32>
    %33 = tpu.matmul %32, %30, %cst_10 {dimension_numbers = #tpu.dot_dimension_numbers<[1], [0], [0], [1], [0, 0, 1, 1], [], []>} : vector<8x4xbf16>, vector<4x256xbf16>, vector<8x256xf32> -> vector<8x256xf32>
    %34 = arith.addf %28, %33 : vector<8x256xf32>
    %35 = vector.extract_strided_slice %0 {offsets = [0, 0, 18], sizes = [1, 4, 256], strides = [1, 1, 1]} : vector<2x4x384xbf16> to vector<1x4x256xbf16>
    %36 = vector.shape_cast %35 : vector<1x4x256xbf16> to vector<4x256xbf16>
    %37 = vector.extract_strided_slice %1 {offsets = [5, 0, 0], sizes = [1, 8, 4], strides = [1, 1, 1]} : vector<9x8x4xbf16> to vector<1x8x4xbf16>
    %38 = vector.shape_cast %37 : vector<1x8x4xbf16> to vector<8x4xbf16>
    %cst_11 = arith.constant dense<0.000000e+00> : vector<8x256xf32>
    %39 = tpu.matmul %38, %36, %cst_11 {dimension_numbers = #tpu.dot_dimension_numbers<[1], [0], [0], [1], [0, 0, 1, 1], [], []>} : vector<8x4xbf16>, vector<4x256xbf16>, vector<8x256xf32> -> vector<8x256xf32>
    %40 = arith.addf %34, %39 : vector<8x256xf32>
    %41 = vector.extract_strided_slice %0 {offsets = [0, 0, 32], sizes = [1, 4, 256], strides = [1, 1, 1]} : vector<2x4x384xbf16> to vector<1x4x256xbf16>
    %42 = vector.shape_cast %41 : vector<1x4x256xbf16> to vector<4x256xbf16>
    %43 = vector.extract_strided_slice %1 {offsets = [6, 0, 0], sizes = [1, 8, 4], strides = [1, 1, 1]} : vector<9x8x4xbf16> to vector<1x8x4xbf16>
    %44 = vector.shape_cast %43 : vector<1x8x4xbf16> to vector<8x4xbf16>
    %cst_12 = arith.constant dense<0.000000e+00> : vector<8x256xf32>
    %45 = tpu.matmul %44, %42, %cst_12 {dimension_numbers = #tpu.dot_dimension_numbers<[1], [0], [0], [1], [0, 0, 1, 1], [], []>} : vector<8x4xbf16>, vector<4x256xbf16>, vector<8x256xf32> -> vector<8x256xf32>
    %46 = arith.addf %40, %45 : vector<8x256xf32>
    %47 = vector.extract_strided_slice %0 {offsets = [0, 0, 33], sizes = [1, 4, 256], strides = [1, 1, 1]} : vector<2x4x384xbf16> to vector<1x4x256xbf16>
    %48 = vector.shape_cast %47 : vector<1x4x256xbf16> to vector<4x256xbf16>
    %49 = vector.extract_strided_slice %1 {offsets = [7, 0, 0], sizes = [1, 8, 4], strides = [1, 1, 1]} : vector<9x8x4xbf16> to vector<1x8x4xbf16>
    %50 = vector.shape_cast %49 : vector<1x8x4xbf16> to vector<8x4xbf16>
    %cst_13 = arith.constant dense<0.000000e+00> : vector<8x256xf32>
    %51 = tpu.matmul %50, %48, %cst_13 {dimension_numbers = #tpu.dot_dimension_numbers<[1], [0], [0], [1], [0, 0, 1, 1], [], []>} : vector<8x4xbf16>, vector<4x256xbf16>, vector<8x256xf32> -> vector<8x256xf32>
    %52 = arith.addf %46, %51 : vector<8x256xf32>
    %53 = vector.extract_strided_slice %0 {offsets = [0, 0, 34], sizes = [1, 4, 256], strides = [1, 1, 1]} : vector<2x4x384xbf16> to vector<1x4x256xbf16>
    %54 = vector.shape_cast %53 : vector<1x4x256xbf16> to vector<4x256xbf16>
    %55 = vector.extract_strided_slice %1 {offsets = [8, 0, 0], sizes = [1, 8, 4], strides = [1, 1, 1]} : vector<9x8x4xbf16> to vector<1x8x4xbf16>
    %56 = vector.shape_cast %55 : vector<1x8x4xbf16> to vector<8x4xbf16>
    %cst_14 = arith.constant dense<0.000000e+00> : vector<8x256xf32>
    %57 = tpu.matmul %56, %54, %cst_14 {dimension_numbers = #tpu.dot_dimension_numbers<[1], [0], [0], [1], [0, 0, 1, 1], [], []>} : vector<8x4xbf16>, vector<4x256xbf16>, vector<8x256xf32> -> vector<8x256xf32>
    %58 = arith.addf %52, %57 : vector<8x256xf32>
    %c0_15 = arith.constant 0 : index
    %c0_16 = arith.constant 0 : index
    %c0_17 = arith.constant 0 : index
    %59 = vector.load %arg3[%c0_15, %c0_16, %c0_17] : memref<2x8x256xf32, #tpu.memory_space<vmem>>, vector<1x8x256xf32>
    %60 = vector.shape_cast %59 : vector<1x8x256xf32> to vector<8x256xf32>
    %61 = vector.shape_cast %58 : vector<8x256xf32> to vector<1x8x256xf32>
    tpu.vector_store %arg3[%c0_15, %c0_16, %c0_17], %61 {strides = array<i32>} : memref<2x8x256xf32, #tpu.memory_space<vmem>>, vector<1x8x256xf32>,
    %62 = vector.extract_strided_slice %0 {offsets = [1, 0, 0], sizes = [1, 4, 256], strides = [1, 1, 1]} : vector<2x4x384xbf16> to vector<1x4x256xbf16>
    %63 = vector.shape_cast %62 : vector<1x4x256xbf16> to vector<4x256xbf16>
    %64 = vector.extract_strided_slice %1 {offsets = [0, 0, 0], sizes = [1, 8, 4], strides = [1, 1, 1]} : vector<9x8x4xbf16> to vector<1x8x4xbf16>
    %65 = vector.shape_cast %64 : vector<1x8x4xbf16> to vector<8x4xbf16>
    %cst_18 = arith.constant dense<0.000000e+00> : vector<8x256xf32>
    %66 = tpu.matmul %65, %63, %cst_18 {dimension_numbers = #tpu.dot_dimension_numbers<[1], [0], [0], [1], [0, 0, 1, 1], [], []>} : vector<8x4xbf16>, vector<4x256xbf16>, vector<8x256xf32> -> vector<8x256xf32>
    %67 = arith.addf %4, %66 : vector<8x256xf32>
    %68 = vector.extract_strided_slice %0 {offsets = [1, 0, 1], sizes = [1, 4, 256], strides = [1, 1, 1]} : vector<2x4x384xbf16> to vector<1x4x256xbf16>
    %69 = vector.shape_cast %68 : vector<1x4x256xbf16> to vector<4x256xbf16>
    %70 = vector.extract_strided_slice %1 {offsets = [1, 0, 0], sizes = [1, 8, 4], strides = [1, 1, 1]} : vector<9x8x4xbf16> to vector<1x8x4xbf16>
    %71 = vector.shape_cast %70 : vector<1x8x4xbf16> to vector<8x4xbf16>
    %cst_19 = arith.constant dense<0.000000e+00> : vector<8x256xf32>
    %72 = tpu.matmul %71, %69, %cst_19 {dimension_numbers = #tpu.dot_dimension_numbers<[1], [0], [0], [1], [0, 0, 1, 1], [], []>} : vector<8x4xbf16>, vector<4x256xbf16>, vector<8x256xf32> -> vector<8x256xf32>
    %73 = arith.addf %67, %72 : vector<8x256xf32>
    %74 = vector.extract_strided_slice %0 {offsets = [1, 0, 2], sizes = [1, 4, 256], strides = [1, 1, 1]} : vector<2x4x384xbf16> to vector<1x4x256xbf16>
    %75 = vector.shape_cast %74 : vector<1x4x256xbf16> to vector<4x256xbf16>
    %76 = vector.extract_strided_slice %1 {offsets = [2, 0, 0], sizes = [1, 8, 4], strides = [1, 1, 1]} : vector<9x8x4xbf16> to vector<1x8x4xbf16>
    %77 = vector.shape_cast %76 : vector<1x8x4xbf16> to vector<8x4xbf16>
    %cst_20 = arith.constant dense<0.000000e+00> : vector<8x256xf32>
    %78 = tpu.matmul %77, %75, %cst_20 {dimension_numbers = #tpu.dot_dimension_numbers<[1], [0], [0], [1], [0, 0, 1, 1], [], []>} : vector<8x4xbf16>, vector<4x256xbf16>, vector<8x256xf32> -> vector<8x256xf32>
    %79 = arith.addf %73, %78 : vector<8x256xf32>
    %80 = vector.extract_strided_slice %0 {offsets = [1, 0, 16], sizes = [1, 4, 256], strides = [1, 1, 1]} : vector<2x4x384xbf16> to vector<1x4x256xbf16>
    %81 = vector.shape_cast %80 : vector<1x4x256xbf16> to vector<4x256xbf16>
    %82 = vector.extract_strided_slice %1 {offsets = [3, 0, 0], sizes = [1, 8, 4], strides = [1, 1, 1]} : vector<9x8x4xbf16> to vector<1x8x4xbf16>
    %83 = vector.shape_cast %82 : vector<1x8x4xbf16> to vector<8x4xbf16>
    %cst_21 = arith.constant dense<0.000000e+00> : vector<8x256xf32>
    %84 = tpu.matmul %83, %81, %cst_21 {dimension_numbers = #tpu.dot_dimension_numbers<[1], [0], [0], [1], [0, 0, 1, 1], [], []>} : vector<8x4xbf16>, vector<4x256xbf16>, vector<8x256xf32> -> vector<8x256xf32>
    %85 = arith.addf %79, %84 : vector<8x256xf32>
    %86 = vector.extract_strided_slice %0 {offsets = [1, 0, 17], sizes = [1, 4, 256], strides = [1, 1, 1]} : vector<2x4x384xbf16> to vector<1x4x256xbf16>
    %87 = vector.shape_cast %86 : vector<1x4x256xbf16> to vector<4x256xbf16>
    %88 = vector.extract_strided_slice %1 {offsets = [4, 0, 0], sizes = [1, 8, 4], strides = [1, 1, 1]} : vector<9x8x4xbf16> to vector<1x8x4xbf16>
    %89 = vector.shape_cast %88 : vector<1x8x4xbf16> to vector<8x4xbf16>
    %cst_22 = arith.constant dense<0.000000e+00> : vector<8x256xf32>
    %90 = tpu.matmul %89, %87, %cst_22 {dimension_numbers = #tpu.dot_dimension_numbers<[1], [0], [0], [1], [0, 0, 1, 1], [], []>} : vector<8x4xbf16>, vector<4x256xbf16>, vector<8x256xf32> -> vector<8x256xf32>
    %91 = arith.addf %85, %90 : vector<8x256xf32>
    %92 = vector.extract_strided_slice %0 {offsets = [1, 0, 18], sizes = [1, 4, 256], strides = [1, 1, 1]} : vector<2x4x384xbf16> to vector<1x4x256xbf16>
    %93 = vector.shape_cast %92 : vector<1x4x256xbf16> to vector<4x256xbf16>
    %94 = vector.extract_strided_slice %1 {offsets = [5, 0, 0], sizes = [1, 8, 4], strides = [1, 1, 1]} : vector<9x8x4xbf16> to vector<1x8x4xbf16>
    %95 = vector.shape_cast %94 : vector<1x8x4xbf16> to vector<8x4xbf16>
    %cst_23 = arith.constant dense<0.000000e+00> : vector<8x256xf32>
    %96 = tpu.matmul %95, %93, %cst_23 {dimension_numbers = #tpu.dot_dimension_numbers<[1], [0], [0], [1], [0, 0, 1, 1], [], []>} : vector<8x4xbf16>, vector<4x256xbf16>, vector<8x256xf32> -> vector<8x256xf32>
    %97 = arith.addf %91, %96 : vector<8x256xf32>
    %98 = vector.extract_strided_slice %0 {offsets = [1, 0, 32], sizes = [1, 4, 256], strides = [1, 1, 1]} : vector<2x4x384xbf16> to vector<1x4x256xbf16>
    %99 = vector.shape_cast %98 : vector<1x4x256xbf16> to vector<4x256xbf16>
    %100 = vector.extract_strided_slice %1 {offsets = [6, 0, 0], sizes = [1, 8, 4], strides = [1, 1, 1]} : vector<9x8x4xbf16> to vector<1x8x4xbf16>
    %101 = vector.shape_cast %100 : vector<1x8x4xbf16> to vector<8x4xbf16>
    %cst_24 = arith.constant dense<0.000000e+00> : vector<8x256xf32>
    %102 = tpu.matmul %101, %99, %cst_24 {dimension_numbers = #tpu.dot_dimension_numbers<[1], [0], [0], [1], [0, 0, 1, 1], [], []>} : vector<8x4xbf16>, vector<4x256xbf16>, vector<8x256xf32> -> vector<8x256xf32>
    %103 = arith.addf %97, %102 : vector<8x256xf32>
    %104 = vector.extract_strided_slice %0 {offsets = [1, 0, 33], sizes = [1, 4, 256], strides = [1, 1, 1]} : vector<2x4x384xbf16> to vector<1x4x256xbf16>
    %105 = vector.shape_cast %104 : vector<1x4x256xbf16> to vector<4x256xbf16>
    %106 = vector.extract_strided_slice %1 {offsets = [7, 0, 0], sizes = [1, 8, 4], strides = [1, 1, 1]} : vector<9x8x4xbf16> to vector<1x8x4xbf16>
    %107 = vector.shape_cast %106 : vector<1x8x4xbf16> to vector<8x4xbf16>
    %cst_25 = arith.constant dense<0.000000e+00> : vector<8x256xf32>
    %108 = tpu.matmul %107, %105, %cst_25 {dimension_numbers = #tpu.dot_dimension_numbers<[1], [0], [0], [1], [0, 0, 1, 1], [], []>} : vector<8x4xbf16>, vector<4x256xbf16>, vector<8x256xf32> -> vector<8x256xf32>
    %109 = arith.addf %103, %108 : vector<8x256xf32>
    %110 = vector.extract_strided_slice %0 {offsets = [1, 0, 34], sizes = [1, 4, 256], strides = [1, 1, 1]} : vector<2x4x384xbf16> to vector<1x4x256xbf16>
    %111 = vector.shape_cast %110 : vector<1x4x256xbf16> to vector<4x256xbf16>
    %112 = vector.extract_strided_slice %1 {offsets = [8, 0, 0], sizes = [1, 8, 4], strides = [1, 1, 1]} : vector<9x8x4xbf16> to vector<1x8x4xbf16>
    %113 = vector.shape_cast %112 : vector<1x8x4xbf16> to vector<8x4xbf16>
    %cst_26 = arith.constant dense<0.000000e+00> : vector<8x256xf32>
    %114 = tpu.matmul %113, %111, %cst_26 {dimension_numbers = #tpu.dot_dimension_numbers<[1], [0], [0], [1], [0, 0, 1, 1], [], []>} : vector<8x4xbf16>, vector<4x256xbf16>, vector<8x256xf32> -> vector<8x256xf32>
    %115 = arith.addf %109, %114 : vector<8x256xf32>
    %c1 = arith.constant 1 : index
    %c0_27 = arith.constant 0 : index
    %c0_28 = arith.constant 0 : index
    %116 = vector.load %arg3[%c1, %c0_27, %c0_28] : memref<2x8x256xf32, #tpu.memory_space<vmem>>, vector<1x8x256xf32>
    %117 = vector.shape_cast %116 : vector<1x8x256xf32> to vector<8x256xf32>
    %118 = vector.shape_cast %115 : vector<8x256xf32> to vector<1x8x256xf32>
    tpu.vector_store %arg3[%c1, %c0_27, %c0_28], %118 {strides = array<i32>} : memref<2x8x256xf32, #tpu.memory_space<vmem>>, vector<1x8x256xf32>,
    return
  }
}

</mosaic_0001>

<bundles_post_ra>
// kernel: conv_model_forward.1
= control target key start
LH: loop header
LB: loop body
LE: loop exit
PB: predicated region body
PF: predicated region fallthrough
CT: control target
= control target key end

     0   :  { %v36_v0 = vlaneseq  ;;  %v1241_v2 = vmov 1983009808   ;;  %v1242_v4 = vmov 0   ;;  %vm45_vm0 = vcmask 1041408   ;;  %s1243_s16 = smov 127   ;;  %s1244_s18 = smov 126   ;;  %s1439_s0 = inlined_call_operand.vmem [shape: bf16[2,4,384], index: 0, kind: input, shape index: {}]   ;;  %s1440_s1 = inlined_call_operand.vmem [shape: bf16[9,8,4], index: 1, kind: input, shape index: {}]   ;;  %s1441_s2 = inlined_call_operand.vmem [shape: f32[8,1], index: 2, kind: input, shape index: {}]   ;;  %s1442_s3 = inlined_call_operand.vmem [shape: f32[2,8,256], index: 3, kind: output, shape index: {}]  }
   0x1   :  { %v15_v1 = vld [vmem:[%s1439_s0] sm:$0x3f]  ;;  %v34_v3 = vunpack.c.l.s4 %v1241_v2  ;;  %84 = vmatprep.mubr.bf16.mxu0 %v1242_v4  ;;  %640 = vmatprep.mubr.bf16.mxu1 %v1242_v4  ;;  %v16_v8 = vld [vmem:[%s1439_s0 + $0x6] sm:$0x3f]  ;;  %vm41_vm1 = vcmask 31744   ;;  %s1245_s19 = smov 112  }
   0x2   :  { %v37_v5 = vshrl.u32 %v36_v0, 7  ;;  %1238 = vset.pattern.permute.xlu0 %v1242_v4  ;;  %v95_v7 = vcombine.high %v15_v1, %v15_v1  ;;  %v651_v13 = vcombine.high %v16_v8, %v16_v8  ;;  %v17_v18 = vld [vmem:[%s1440_s1] sm:$0xf]  ;;  %s1246_s20 = smov 111   ;;  %s1247_s21 = smov 110   ;;  %vm109_vm2 = vcmask 1039360  }
   0x3   :  { %v35_v6 = vunpack.c.0.s8 %v34_v3  ;;  %s1248_s22 = smov 96   ;;  %s1249_s23 = smov 95   ;;  %v26_v20 = vld [vmem:[%s1441_s2] sm:$0xff]  ;;  %vm170_vm3 = vcmask 1031168   ;;  %v19_v41 = vld [vmem:[%s1440_s1 + $0x8] sm:$0xf] }
   0x4   :  { %s1250_s24 = smov 94   ;;  %v18_v28 = vld [vmem:[%s1440_s1 + $0x4] sm:$0xf]  ;;  %vm231_vm4 = vcmask 916480   ;;  %v20_v54 = vld [vmem:[%s1440_s1 + $0xc] sm:$0xf] }
   0x5   :  { %v38_v9 = vsub.s32 %v35_v6, %v37_v5  ;;  %vm292_vm5 = vcmask 908288   ;;  %v21_v3 = vld [vmem:[%s1440_s1 + $0x10] sm:$0xf]  ;;  %vm353_vm6 = vcmask 900096   ;;  %vm414_vm7 = vcmask 785408  }
   0x6   :  { %vm475_vm8 = vcmask 777216   ;;  %vm536_vm9 = vcmask 769024  }
   0x7   :  { %v1280_v10 = vrot.slane %v95_v7, %v38_v9  ;;  %v1282_v11 = vrot.slane %v16_v8, %v38_v9  ;;  %v1284_v12 = vrot.slane %v15_v1, %v38_v9  ;;  %v658_v19 = vrot.slane %v651_v13, %v38_v9 }
   0x9   :  { %107 = vrot.lane.b32.xlu1 %v1280_v10, %s1243_s16  ;;  %103 = vrot.lane.b32.xlu0 %v1284_v12, %s1243_s16  ;;  %v40_v14 = vcombine.high %v1284_v12, %v1284_v12  ;;  %v1292_v15 = vcombine.high %v1282_v11, %v1282_v11  ;;  %v47_v16 = vsel %vm45_vm0, %v1284_v12, 0  ;;  %v603_v17 = vsel %vm45_vm0, %v1282_v11, 0 }
   0xb   :  { %1122 = vmatprep.subr.msk.bf16.mxu0 %vm45_vm0, %v40_v14  ;;  %1140 = vmatprep.subr.msk.bf16.mxu1 %vm45_vm0, %v1292_v15 }
   0xc   :  { %53 = vmatpush1.bf16.msra.mxu0 %v47_v16  ;;  %609 = vmatpush1.bf16.msra.mxu1 %v603_v17  ;;  %v22_v17 = vld [vmem:[%s1440_s1 + $0x14] sm:$0xf] }
   0xd   :  { %659 = vrot.lane.b32.xlu1 %v1282_v11, %s1243_s16  ;;  %105 = vrot.lane.b32.xlu0 %v40_v14, %s1243_s16 }
   0xf   :  { %1123 = vmatmul.mubr.msk.bf16.vlgmr.msra.gmra.mrb[0].mxu0 %vm41_vm1, %v17_v18  ;;  %1141 = vmatmul.mubr.msk.bf16.vlgmr.msra.gmra.mrb[0].mxu1 %vm41_vm1, %v17_v18 }
  0x10   :  { %153 = vmatprep.mubr.bf16.mxu0 %v1242_v4  ;;  %705 = vmatprep.mubr.bf16.mxu1 %v1242_v4 }
  0x11   :  { %663 = vrot.lane.b32.xlu1 %v658_v19, %s1243_s16  ;;  %661 = vrot.lane.b32.xlu0 %v1292_v15, %s1243_s16 }
  0x15   :  { %166 = vrot.lane.b32.xlu1 %v40_v14, %s1244_s18  ;;  %164 = vrot.lane.b32.xlu0 %v1284_v12, %s1244_s18 }
  0x19   :  { %716 = vrot.lane.b32.xlu1 %v1282_v11, %s1244_s18  ;;  %168 = vrot.lane.b32.xlu0 %v1280_v10, %s1244_s18 }
  0x1d   :  { %720 = vrot.lane.b32.xlu1 %v658_v19, %s1244_s18  ;;  %718 = vrot.lane.b32.xlu0 %v1292_v15, %s1244_s18 }
  0x21   :  { %227 = vrot.lane.b32.xlu1 %v40_v14, %s1245_s19  ;;  %225 = vrot.lane.b32.xlu0 %v1284_v12, %s1245_s19 }
  0x25   :  { %773 = vrot.lane.b32.xlu1 %v1282_v11, %s1245_s19  ;;  %229 = vrot.lane.b32.xlu0 %v1280_v10, %s1245_s19 }
  0x29   :  { %777 = vrot.lane.b32.xlu1 %v658_v19, %s1245_s19  ;;  %775 = vrot.lane.b32.xlu0 %v1292_v15, %s1245_s19 }
  0x2d   :  { %288 = vrot.lane.b32.xlu1 %v40_v14, %s1246_s20  ;;  %286 = vrot.lane.b32.xlu0 %v1284_v12, %s1246_s20 }
  0x31   :  { %830 = vrot.lane.b32.xlu1 %v1282_v11, %s1246_s20  ;;  %290 = vrot.lane.b32.xlu0 %v1280_v10, %s1246_s20 }
  0x35   :  { %834 = vrot.lane.b32.xlu1 %v658_v19, %s1246_s20  ;;  %832 = vrot.lane.b32.xlu0 %v1292_v15, %s1246_s20 }
  0x39   :  { %349 = vrot.lane.b32.xlu1 %v40_v14, %s1247_s21  ;;  %347 = vrot.lane.b32.xlu0 %v1284_v12, %s1247_s21 }
  0x3d   :  { %887 = vrot.lane.b32.xlu1 %v1282_v11, %s1247_s21  ;;  %351 = vrot.lane.b32.xlu0 %v1280_v10, %s1247_s21 }
  0x41   :  { %891 = vrot.lane.b32.xlu1 %v658_v19, %s1247_s21  ;;  %889 = vrot.lane.b32.xlu0 %v1292_v15, %s1247_s21 }
  0x45   :  { %410 = vrot.lane.b32.xlu1 %v40_v14, %s1248_s22  ;;  %408 = vrot.lane.b32.xlu0 %v1284_v12, %s1248_s22 }
  0x49   :  { %944 = vrot.lane.b32.xlu1 %v1282_v11, %s1248_s22  ;;  %412 = vrot.lane.b32.xlu0 %v1280_v10, %s1248_s22 }
  0x4d   :  { %948 = vrot.lane.b32.xlu1 %v658_v19, %s1248_s22  ;;  %946 = vrot.lane.b32.xlu0 %v1292_v15, %s1248_s22 }
  0x51   :  { %471 = vrot.lane.b32.xlu1 %v40_v14, %s1249_s23  ;;  %469 = vrot.lane.b32.xlu0 %v1284_v12, %s1249_s23 }
  0x55   :  { %1001 = vrot.lane.b32.xlu1 %v1282_v11, %s1249_s23  ;;  %473 = vrot.lane.b32.xlu0 %v1280_v10, %s1249_s23 }
  0x59   :  { %1005 = vrot.lane.b32.xlu1 %v658_v19, %s1249_s23  ;;  %1003 = vrot.lane.b32.xlu0 %v1292_v15, %s1249_s23 }
  0x5d   :  { %532 = vrot.lane.b32.xlu1 %v40_v14, %s1250_s24  ;;  %530 = vrot.lane.b32.xlu0 %v1284_v12, %s1250_s24 }
  0x61   :  { %1058 = vrot.lane.b32.xlu1 %v1282_v11, %s1250_s24  ;;  %534 = vrot.lane.b32.xlu0 %v1280_v10, %s1250_s24 }
  0x65   :  { %1062 = vrot.lane.b32.xlu1 %v658_v19, %s1250_s24  ;;  %1060 = vrot.lane.b32.xlu0 %v1292_v15, %s1250_s24 }
  0x69   :  { %29 = vperm.xlu0 %1238, %v26_v20  }
  0x7b   :  { %v108_v21 = vpop.permute.xlu1 %107  ;;  %v104_v22 = vpop.permute.xlu0 %103 }
  0x7f   :  { %v660_v23 = vpop.permute.xlu1 %659  ;;  %v106_v24 = vpop.permute.xlu0 %105 }
  0x80   :  { %v110_v25 = vsel %vm109_vm2, %v104_v22, %v106_v24  ;;  %v111_v26 = vsel %vm109_vm2, %v106_v24, %v108_v21 }
  0x81   :  { %v116_v27 = vsel %vm45_vm0, %v110_v25, 0  ;;  %1124 = vmatprep.subr.msk.bf16.mxu0 %vm45_vm0, %v111_v26 }
  0x82   :  { %122 = vmatpush1.bf16.msra.mxu0 %v116_v27 }
  0x83   :  { %v664_v29 = vpop.permute.xlu1 %663  ;;  %v662_v30 = vpop.permute.xlu0 %661 }
  0x84   :  { %v665_v31 = vsel %vm109_vm2, %v660_v23, %v662_v30  ;;  %v666_v32 = vsel %vm109_vm2, %v662_v30, %v664_v29  ;;  %v23_v30 = vld [vmem:[%s1440_s1 + $0x18] sm:$0xf] }
  0x85   :  { %v668_v33 = vsel %vm45_vm0, %v665_v31, 0  ;;  %1125 = vmatmul.mubr.msk.bf16.vlgmr.msra.gmra.mrb[0].mxu0 %vm41_vm1, %v18_v28  ;;  %1142 = vmatprep.subr.msk.bf16.mxu1 %vm45_vm0, %v666_v32 }
  0x86   :  { %674 = vmatpush1.bf16.msra.mxu1 %v668_v33  ;;  %214 = vmatprep.mubr.bf16.mxu0 %v1242_v4 }
  0x87   :  { %v167_v34 = vpop.permute.xlu1 %166  ;;  %v165_v35 = vpop.permute.xlu0 %164 }
  0x88   :  { %v171_v36 = vsel %vm170_vm3, %v165_v35, %v167_v34 }
  0x89   :  { %1143 = vmatmul.mubr.msk.bf16.vlgmr.msra.gmra.mrb[0].mxu1 %vm41_vm1, %v18_v28  ;;  %v177_v40 = vsel %vm45_vm0, %v171_v36, 0 }
  0x8a   :  { %762 = vmatprep.mubr.bf16.mxu1 %v1242_v4 }
  0x8b   :  { %v717_v37 = vpop.permute.xlu1 %716  ;;  %v169_v38 = vpop.permute.xlu0 %168 }
  0x8c   :  { %v172_v39 = vsel %vm170_vm3, %v167_v34, %v169_v38 }
  0x8d   :  { %1126 = vmatprep.subr.msk.bf16.mxu0 %vm45_vm0, %v172_v39 }
  0x8e   :  { %183 = vmatpush1.bf16.msra.mxu0 %v177_v40 }
  0x8f   :  { %v721_v42 = vpop.permute.xlu1 %720  ;;  %v719_v43 = vpop.permute.xlu0 %718 }
  0x90   :  { %v722_v44 = vsel %vm170_vm3, %v717_v37, %v719_v43  ;;  %v723_v45 = vsel %vm170_vm3, %v719_v43, %v721_v42  ;;  %v24_v43 = vld [vmem:[%s1440_s1 + $0x1c] sm:$0xf] }
  0x91   :  { %v725_v46 = vsel %vm45_vm0, %v722_v44, 0  ;;  %1127 = vmatmul.mubr.msk.bf16.vlgmr.msra.gmra.mrb[0].mxu0 %vm41_vm1, %v19_v41  ;;  %1144 = vmatprep.subr.msk.bf16.mxu1 %vm45_vm0, %v723_v45 }
  0x92   :  { %731 = vmatpush1.bf16.msra.mxu1 %v725_v46  ;;  %275 = vmatprep.mubr.bf16.mxu0 %v1242_v4 }
  0x93   :  { %v228_v47 = vpop.permute.xlu1 %227  ;;  %v226_v48 = vpop.permute.xlu0 %225 }
  0x94   :  { %v232_v49 = vsel %vm231_vm4, %v226_v48, %v228_v47 }
  0x95   :  { %1145 = vmatmul.mubr.msk.bf16.vlgmr.msra.gmra.mrb[0].mxu1 %vm41_vm1, %v19_v41  ;;  %v238_v53 = vsel %vm45_vm0, %v232_v49, 0 }
  0x96   :  { %819 = vmatprep.mubr.bf16.mxu1 %v1242_v4 }
  0x97   :  { %v774_v50 = vpop.permute.xlu1 %773  ;;  %v230_v51 = vpop.permute.xlu0 %229 }
  0x98   :  { %v233_v52 = vsel %vm231_vm4, %v228_v47, %v230_v51 }
  0x99   :  { %1128 = vmatprep.subr.msk.bf16.mxu0 %vm45_vm0, %v233_v52 }
  0x9a   :  { %244 = vmatpush1.bf16.msra.mxu0 %v238_v53 }
  0x9b   :  { %v778_v55 = vpop.permute.xlu1 %777  ;;  %v776_v56 = vpop.permute.xlu0 %775 }
  0x9c   :  { %v779_v57 = vsel %vm231_vm4, %v774_v50, %v776_v56  ;;  %v780_v58 = vsel %vm231_vm4, %v776_v56, %v778_v55  ;;  %v25_v56 = vld [vmem:[%s1440_s1 + $0x20] sm:$0xf] }
  0x9d   :  { %v782_v59 = vsel %vm45_vm0, %v779_v57, 0  ;;  %1129 = vmatmul.mubr.msk.bf16.vlgmr.msra.gmra.mrb[0].mxu0 %vm41_vm1, %v20_v54  ;;  %1146 = vmatprep.subr.msk.bf16.mxu1 %vm45_vm0, %v780_v58 }
  0x9e   :  { %788 = vmatpush1.bf16.msra.mxu1 %v782_v59  ;;  %336 = vmatprep.mubr.bf16.mxu0 %v1242_v4 }
  0x9f   :  { %v289_v60 = vpop.permute.xlu1 %288  ;;  %v287_v61 = vpop.permute.xlu0 %286 }
  0xa0   :  { %v293_v62 = vsel %vm292_vm5, %v287_v61, %v289_v60 }
  0xa1   :  { %1147 = vmatmul.mubr.msk.bf16.vlgmr.msra.gmra.mrb[0].mxu1 %vm41_vm1, %v20_v54  ;;  %v299_v2 = vsel %vm45_vm0, %v293_v62, 0 }
  0xa2   :  { %876 = vmatprep.mubr.bf16.mxu1 %v1242_v4 }
  0xa3   :  { %v831_v63 = vpop.permute.xlu1 %830  ;;  %v291_v0 = vpop.permute.xlu0 %290 }
  0xa4   :  { %v294_v1 = vsel %vm292_vm5, %v289_v60, %v291_v0 }
  0xa5   :  { %1130 = vmatprep.subr.msk.bf16.mxu0 %vm45_vm0, %v294_v1 }
  0xa6   :  { %305 = vmatpush1.bf16.msra.mxu0 %v299_v2 }
  0xa7   :  { %v835_v5 = vpop.permute.xlu1 %834  ;;  %v833_v6 = vpop.permute.xlu0 %832 }
  0xa8   :  { %v836_v7 = vsel %vm292_vm5, %v831_v63, %v833_v6  ;;  %v837_v8 = vsel %vm292_vm5, %v833_v6, %v835_v5 }
  0xa9   :  { %v839_v9 = vsel %vm45_vm0, %v836_v7, 0  ;;  %1131 = vmatmul.mubr.msk.bf16.vlgmr.msra.gmra.mrb[0].mxu0 %vm41_vm1, %v21_v3  ;;  %1148 = vmatprep.subr.msk.bf16.mxu1 %vm45_vm0, %v837_v8 }
  0xaa   :  { %845 = vmatpush1.bf16.msra.mxu1 %v839_v9  ;;  %397 = vmatprep.mubr.bf16.mxu0 %v1242_v4 }
  0xab   :  { %v350_v10 = vpop.permute.xlu1 %349  ;;  %v348_v11 = vpop.permute.xlu0 %347 }
  0xac   :  { %v354_v12 = vsel %vm353_vm6, %v348_v11, %v350_v10 }
  0xad   :  { %1149 = vmatmul.mubr.msk.bf16.vlgmr.msra.gmra.mrb[0].mxu1 %vm41_vm1, %v21_v3  ;;  %v360_v16 = vsel %vm45_vm0, %v354_v12, 0 }
  0xae   :  { %933 = vmatprep.mubr.bf16.mxu1 %v1242_v4 }
  0xaf   :  { %v888_v13 = vpop.permute.xlu1 %887  ;;  %v352_v14 = vpop.permute.xlu0 %351 }
  0xb0   :  { %v355_v15 = vsel %vm353_vm6, %v350_v10, %v352_v14 }
  0xb1   :  { %1132 = vmatprep.subr.msk.bf16.mxu0 %vm45_vm0, %v355_v15 }
  0xb2   :  { %366 = vmatpush1.bf16.msra.mxu0 %v360_v16 }
  0xb3   :  { %v892_v18 = vpop.permute.xlu1 %891  ;;  %v890_v19 = vpop.permute.xlu0 %889 }
  0xb4   :  { %v893_v20 = vsel %vm353_vm6, %v888_v13, %v890_v19  ;;  %v894_v21 = vsel %vm353_vm6, %v890_v19, %v892_v18 }
  0xb5   :  { %v896_v22 = vsel %vm45_vm0, %v893_v20, 0  ;;  %1133 = vmatmul.mubr.msk.bf16.vlgmr.msra.gmra.mrb[0].mxu0 %vm41_vm1, %v22_v17  ;;  %1150 = vmatprep.subr.msk.bf16.mxu1 %vm45_vm0, %v894_v21 }
  0xb6   :  { %902 = vmatpush1.bf16.msra.mxu1 %v896_v22  ;;  %458 = vmatprep.mubr.bf16.mxu0 %v1242_v4 }
  0xb7   :  { %v411_v23 = vpop.permute.xlu1 %410  ;;  %v409_v24 = vpop.permute.xlu0 %408 }
  0xb8   :  { %v415_v25 = vsel %vm414_vm7, %v409_v24, %v411_v23 }
  0xb9   :  { %1151 = vmatmul.mubr.msk.bf16.vlgmr.msra.gmra.mrb[0].mxu1 %vm41_vm1, %v22_v17  ;;  %v421_v29 = vsel %vm45_vm0, %v415_v25, 0 }
  0xba   :  { %990 = vmatprep.mubr.bf16.mxu1 %v1242_v4 }
  0xbb   :  { %v945_v26 = vpop.permute.xlu1 %944  ;;  %v413_v27 = vpop.permute.xlu0 %412 }
  0xbc   :  { %v416_v28 = vsel %vm414_vm7, %v411_v23, %v413_v27 }
  0xbd   :  { %1134 = vmatprep.subr.msk.bf16.mxu0 %vm45_vm0, %v416_v28 }
  0xbe   :  { %427 = vmatpush1.bf16.msra.mxu0 %v421_v29 }
  0xbf   :  { %v949_v31 = vpop.permute.xlu1 %948  ;;  %v947_v32 = vpop.permute.xlu0 %946 }
  0xc0   :  { %v950_v33 = vsel %vm414_vm7, %v945_v26, %v947_v32  ;;  %v951_v34 = vsel %vm414_vm7, %v947_v32, %v949_v31 }
  0xc1   :  { %v953_v35 = vsel %vm45_vm0, %v950_v33, 0  ;;  %1135 = vmatmul.mubr.msk.bf16.vlgmr.msra.gmra.mrb[0].mxu0 %vm41_vm1, %v23_v30  ;;  %1152 = vmatprep.subr.msk.bf16.mxu1 %vm45_vm0, %v951_v34 }
  0xc2   :  { %959 = vmatpush1.bf16.msra.mxu1 %v953_v35  ;;  %519 = vmatprep.mubr.bf16.mxu0 %v1242_v4 }
  0xc3   :  { %v472_v36 = vpop.permute.xlu1 %471  ;;  %v470_v37 = vpop.permute.xlu0 %469 }
  0xc4   :  { %v476_v38 = vsel %vm475_vm8, %v470_v37, %v472_v36 }
  0xc5   :  { %1153 = vmatmul.mubr.msk.bf16.vlgmr.msra.gmra.mrb[0].mxu1 %vm41_vm1, %v23_v30  ;;  %v482_v42 = vsel %vm45_vm0, %v476_v38, 0 }
  0xc6   :  { %1047 = vmatprep.mubr.bf16.mxu1 %v1242_v4 }
  0xc7   :  { %v1002_v39 = vpop.permute.xlu1 %1001  ;;  %v474_v40 = vpop.permute.xlu0 %473 }
  0xc8   :  { %v477_v41 = vsel %vm475_vm8, %v472_v36, %v474_v40 }
  0xc9   :  { %1136 = vmatprep.subr.msk.bf16.mxu0 %vm45_vm0, %v477_v41 }
  0xca   :  { %488 = vmatpush1.bf16.msra.mxu0 %v482_v42 }
  0xcb   :  { %v1006_v44 = vpop.permute.xlu1 %1005  ;;  %v1004_v45 = vpop.permute.xlu0 %1003 }
  0xcc   :  { %v1007_v46 = vsel %vm475_vm8, %v1002_v39, %v1004_v45  ;;  %v1008_v47 = vsel %vm475_vm8, %v1004_v45, %v1006_v44 }
  0xcd   :  { %v1010_v48 = vsel %vm45_vm0, %v1007_v46, 0  ;;  %1137 = vmatmul.mubr.msk.bf16.vlgmr.msra.gmra.mrb[0].mxu0 %vm41_vm1, %v24_v43  ;;  %1154 = vmatprep.subr.msk.bf16.mxu1 %vm45_vm0, %v1008_v47 }
  0xce   :  { %1016 = vmatpush1.bf16.msra.mxu1 %v1010_v48  ;;  %580 = vmatprep.mubr.bf16.mxu0 %v1242_v4 }
  0xcf   :  { %v533_v49 = vpop.permute.xlu1 %532  ;;  %v531_v50 = vpop.permute.xlu0 %530 }
  0xd0   :  { %v537_v51 = vsel %vm536_vm9, %v531_v50, %v533_v49 }
  0xd1   :  { %1155 = vmatmul.mubr.msk.bf16.vlgmr.msra.gmra.mrb[0].mxu1 %vm41_vm1, %v24_v43  ;;  %v543_v55 = vsel %vm45_vm0, %v537_v51, 0 }
  0xd2   :  { %1104 = vmatprep.mubr.bf16.mxu1 %v1242_v4 }
  0xd3   :  { %v1059_v52 = vpop.permute.xlu1 %1058  ;;  %v535_v53 = vpop.permute.xlu0 %534 }
  0xd4   :  { %v538_v54 = vsel %vm536_vm9, %v533_v49, %v535_v53 }
  0xd5   :  { %1138 = vmatprep.subr.msk.bf16.mxu0 %vm45_vm0, %v538_v54 }
  0xd6   :  { %549 = vmatpush1.bf16.msra.mxu0 %v543_v55 }
  0xd7   :  { %v1063_v57 = vpop.permute.xlu1 %1062  ;;  %v1061_v58 = vpop.permute.xlu0 %1060 }
  0xd8   :  { %v1064_v59 = vsel %vm536_vm9, %v1059_v52, %v1061_v58  ;;  %v1065_v60 = vsel %vm536_vm9, %v1061_v58, %v1063_v57 }
  0xd9   :  { %v1067_v61 = vsel %vm45_vm0, %v1064_v59, 0  ;;  %1139 = vmatmul.mubr.msk.bf16.vlgmr.msra.gmra.mrb[0].mxu0 %vm41_vm1, %v25_v56  ;;  %1156 = vmatprep.subr.msk.bf16.mxu1 %vm45_vm0, %v1065_v60 }
  0xda   :  { %1073 = vmatpush1.bf16.msra.mxu1 %v1067_v61 }
  0xdd   :  { %1157 = vmatmul.mubr.msk.bf16.vlgmr.msra.gmra.mrb[0].mxu1 %vm41_vm1, %v25_v56 }
  0xe8   :  { %v30_v4 = vpop.permute.xlu0 %29 }
 0x1ac   :  { %v582_v62 = vpop.f32.mrb[0].mxu0 }
 0x1ad   :  { %v1160_v63 = vadd.f32 %v582_v62, %v30_v4  ;;  %v584_v0 = vpop.f32.mrb[1].mxu0 }
 0x1ae   :  { %v1161_v1 = vadd.f32 %v584_v0, %v30_v4  ;;  %v586_v2 = vpop.f32.mrb[2].mxu0 }
 0x1af   :  { %591 = vst [vmem:[%s1442_s3] sm:$0xff] %v1160_v63  ;;  %v587_v3 = vpop.f32.mrb[3].mxu0 }
 0x1b0   :  { %592 = vst [vmem:[%s1442_s3 + $0x8] sm:$0xff] %v1161_v1  ;;  %v1106_v5 = vpop.f32.mrb[0].mxu1 }
 0x1b1   :  { %v1162_v6 = vadd.f32 %v1106_v5, %v30_v4  ;;  %v1108_v7 = vpop.f32.mrb[1].mxu1 }
 0x1b2   :  { %v1163_v8 = vadd.f32 %v1108_v7, %v30_v4  ;;  %v1110_v9 = vpop.f32.mrb[2].mxu1 }
 0x1b3   :  { %1158 = vst [vmem:[%s1442_s3 + $0x10] sm:$0xff] %v1162_v6  ;;  %v1111_v10 = vpop.f32.mrb[3].mxu1 }
 0x1b4   :  { %1159 = vst [vmem:[%s1442_s3 + $0x18] sm:$0xff] %v1163_v8 }

</bundles_post_ra>
